<compile_context>
chip_gen: v7x
topology: tpu7x:2x2x1
jax: 0.10.0
libtpu: 0.0.40
codegen_flags: <defaults>
</compile_context>

<pallas_src>
import jax
import jax.numpy as jnp
from jax.experimental import pallas as pl
from jax.experimental.pallas import tpu as pltpu


# ----------------------------------------------------------------------------
# alpha specialization: return (pow_fn, #EUP transcendentals per element)
# ----------------------------------------------------------------------------
def _pow_fn_for_alpha(alpha):
    alpha = float(alpha)
    if alpha == 0.0:
        return (lambda y: jnp.ones_like(y)), 0
    if alpha == 1.0:
        return (lambda y: y), 0
    if alpha == 2.0:
        return (lambda y: y * y), 0
    if alpha == 3.0:
        return (lambda y: y * y * y), 0
    if alpha == 0.5:
        return jnp.sqrt, 1
    if alpha == 1.5:
        return (lambda y: y * jnp.sqrt(y)), 1
    if alpha == 0.25:
        return (lambda y: jnp.sqrt(jnp.sqrt(y))), 2
    if alpha == 0.75:
        return (lambda y: jnp.sqrt(y) * jnp.sqrt(jnp.sqrt(y))), 2
    if alpha == -0.5:
        return jax.lax.rsqrt, 1
    if alpha == -1.0:
        return (lambda y: pl.reciprocal(y)), 1
    if alpha == -2.0:
        return (lambda y: pl.reciprocal(y * y)), 1
    # Generic: y^alpha = exp(alpha * log(y))  (2 EUP pushes)
    return (lambda y: jnp.exp(alpha * jnp.log(y))), 2


def _make_kernel(alpha):
    """Build the activation kernel specialized on the static exponent alpha."""
    pow_fn, pow_transc = _pow_fn_for_alpha(alpha)

    def kernel(params_ref, x_ref, o_ref):
        # params_ref lives in SMEM (scalar prefetch): [a, b, c, d, f, g]
        a = params_ref[0]
        b = params_ref[1]
        c = params_ref[2]
        d = params_ref[3]
        f = params_ref[4]
        g = params_ref[5]

        x = x_ref[...].astype(jnp.float32)
        ax = jnp.abs(x)
        pow_term = pow_fn(ax + c) + d
        log_term = jnp.log(ax + f) + g
        o_ref[...] = (a * jnp.tanh(b * x) * pow_term * log_term).astype(o_ref.dtype)

    # tanh + log + pow_fn's transcendentals
    return kernel, 2 + pow_transc


_LANE_CANDIDATES = (2048, 1024, 512, 256, 128)


# ----------------------------------------------------------------------------
# Core slab runner: flat array whose size is a multiple of `lane`.
# ----------------------------------------------------------------------------
def _run_slab(flat, params, alpha, lane, *, target_block_bytes,
              vmem_limit_bytes, min_split_bytes):
    n = flat.shape[0]
    dtype = flat.dtype
    itemsize = jnp.dtype(dtype).itemsize
    rows = n // lane

    # Native sublane quantum per dtype: f32 -> 8, bf16 -> 16, int8/fp8 -> 32.
    quantum = max(8, 32 // itemsize)

    slab_bytes = rows * lane * itemsize
    if slab_bytes <= min_split_bytes or rows <= 4 * quantum:
        # Tiny slab: per-step overhead dominates any pipelining win.
        row_tile = rows
    else:
        # Cap block size at ~target_block_bytes AND force >= 4 grid steps so
        # DMA/compute overlap and the 2-TC split (v7x) are both available.
        by_bytes = (target_block_bytes // (lane * itemsize)) // quantum * quantum
        by_grid = (rows // 4) // quantum * quantum
        max_rt = max(quantum, min(by_bytes, by_grid))
        row_tile = max_rt
        for rt in range(max_rt, quantum - 1, -quantum):
            if rows % rt == 0:
                row_tile = rt
                break
        # If no exact divisor found, keep max_rt: Pallas masks the trailing
        # partial block (garbage in OOB input lanes is discarded on store).

    grid = (pl.cdiv(rows, row_tile),)
    kernel, n_transc = _make_kernel(alpha)

    cost = pl.CostEstimate(
        flops=10 * n,
        transcendentals=n_transc * n,
        bytes_accessed=2 * n * itemsize,
    )

    out2d = pl.pallas_call(
        kernel,
        out_shape=jax.ShapeDtypeStruct((rows, lane), dtype),
        grid_spec=pltpu.PrefetchScalarGridSpec(
            num_scalar_prefetch=1,                       # params -> SMEM
            grid=grid,
            in_specs=[pl.BlockSpec((row_tile, lane), lambda i, p: (i, 0))],
            out_specs=pl.BlockSpec((row_tile, lane), lambda i, p: (i, 0)),
        ),
        compiler_params=pltpu.CompilerParams(
            dimension_semantics=("parallel",),           # 2-TC split on v7x
            vmem_limit_bytes=vmem_limit_bytes,
        ),
        cost_estimate=cost,
    )(params, flat.reshape(rows, lane))
    return out2d.reshape(-1)


def _activation_jnp(x, params, alpha):
    """Tiny XLA epilogue for ragged tails (< 128 elements)."""
    a, b, c, d, f, g = (params[i] for i in range(6))
    xf = x.astype(jnp.float32)
    ax = jnp.abs(xf)
    out = (a * jnp.tanh(b * xf)
           * (jnp.power(ax + c, alpha) + d)
           * (jnp.log(ax + f) + g))
    return out.astype(x.dtype)


# ----------------------------------------------------------------------------
# Public entry point
# ----------------------------------------------------------------------------
def activation_forward(x, params, alpha, *,
                       target_block_bytes=4 << 20,       # ~4 MiB blocks
                       vmem_limit_bytes=48 * 1024 * 1024,
                       min_split_bytes=512 * 1024):
    """Elementwise gaussian_preact activation via a Pallas TPU kernel.

    x:      any-shape float array (e.g. NCHW activations)
    params: float array of shape (6,) = [a, b, c, d, f, g]
    alpha:  static Python float exponent (= 1 - 2/theta, a fixed buffer)
    """
    orig_shape = x.shape
    flat = x.reshape(-1)
    n = flat.shape[0]
    if n == 0:
        return x

    params = params.astype(jnp.float32)

    # Widest lane dim (multiple of 128) dividing n -> lane-dense, no padding.
    lane = None
    for cand in _LANE_CANDIDATES:
        if n % cand == 0:
            lane = cand
            break

    if lane is not None:
        out = _run_slab(flat, params, alpha, lane,
                        target_block_bytes=target_block_bytes,
                        vmem_limit_bytes=vmem_limit_bytes,
                        min_split_bytes=min_split_bytes)
        return out.reshape(orig_shape)

    # Ragged fallback (no full-array pad/copy): kernel on the largest
    # 128-divisible prefix + tiny XLA epilogue for the < 128-element tail.
    n_main = (n // 128) * 128
    if n_main == 0:
        return _activation_jnp(flat, params, alpha).reshape(orig_shape)

    main_lane = 128
    for cand in _LANE_CANDIDATES:
        if n_main % cand == 0:
            main_lane = cand
            break
    main = _run_slab(flat[:n_main], params, alpha, main_lane,
                     target_block_bytes=target_block_bytes,
                     vmem_limit_bytes=vmem_limit_bytes,
                     min_split_bytes=min_split_bytes)
    tail = _activation_jnp(flat[n_main:], params, alpha)
    return jnp.concatenate([main, tail]).reshape(orig_shape)


def make_params(theta, a, b, c, d, f, g, dtype=jnp.float32):
    alpha = 1.0 - 2.0 / theta
    return jnp.array([a, b, c, d, f, g], dtype=dtype), alpha


def reference_forward(x, params, alpha):
    a, b, c, d, f, g = [params[i] for i in range(6)]
    xf = x.astype(jnp.float32)
    ax = jnp.abs(xf)
    return (a * jnp.tanh(b * xf)
            * (jnp.power(ax + c, alpha) + d)
            * (jnp.log(ax + f) + g))


if __name__ == "__main__":
    key = jax.random.PRNGKey(0)

    # Test 1: NCHW activations; theta=4 -> alpha=0.5 (sqrt fast path).
    # n = 2048 -> lane=2048, rows=1, single block.
    x1 = jax.random.normal(key, (2, 4, 16, 16), dtype=jnp.float32)
    params1, alpha1 = make_params(theta=4.0, a=1.1, b=0.9, c=0.5, d=0.2, f=0.7, g=0.3)
    out1 = jax.block_until_ready(activation_forward(x1, params1, alpha1))
    ref1 = reference_forward(x1, params1, alpha1)
    assert out1.shape == x1.shape and out1.dtype == x1.dtype
    assert jnp.allclose(out1, ref1, atol=1e-5, rtol=1e-5), "mismatch vs reference (test 1)"

    # Test 2: multi-block grid + generic-alpha (exp/log) path.
    # n = 32768 -> lane=2048, rows=16; min_split_bytes=0 + tiny block target
    # forces a multi-step grid with an exact-divisor row tile.
    x2 = jax.random.normal(jax.random.PRNGKey(0), (4, 8, 32, 32), dtype=jnp.float32)
    params2, alpha2 = make_params(theta=3.0, a=0.8, b=1.2, c=0.4, d=0.1, f=0.6, g=-0.2)
    out2 = jax.block_until_ready(
        activation_forward(x2, params2, alpha2,
                           target_block_bytes=64 * 1024, min_split_bytes=0))
    ref2 = reference_forward(x2, params2, alpha2)
    assert jnp.allclose(out2, ref2, atol=1e-5, rtol=1e-5), "mismatch vs reference (test 2)"

    # Test 3: non-divisor row_tile -> masked trailing partial block.
    # n = 40960 -> lane=2048, rows=20; row_tile=8 -> grid=3, last block partial.
    x3 = jax.random.normal(key, (5, 8, 32, 32), dtype=jnp.float32)
    out3 = jax.block_until_ready(
        activation_forward(x3, params2, alpha2,
                           target_block_bytes=24 * 1024, min_split_bytes=0))
    ref3 = reference_forward(x3, params2, alpha2)
    assert jnp.allclose(out3, ref3, atol=1e-5, rtol=1e-5), "mismatch vs reference (test 3)"

    # Test 4: ragged element count -> prefix kernel + tiny XLA tail epilogue.
    x4 = jax.random.normal(key, (3, 5, 7, 11), dtype=jnp.float32)
    out4 = jax.block_until_ready(activation_forward(x4, params1, alpha1))
    ref4 = reference_forward(x4, params1, alpha1)
    assert out4.shape == x4.shape
    assert jnp.allclose(out4, ref4, atol=1e-5, rtol=1e-5), "mismatch vs reference (test 4)"

    # Test 5: bf16 activations (dtype-aware tiling; compute in f32, store bf16).
    x5 = jax.random.normal(key, (2, 4, 16, 16), dtype=jnp.bfloat16)
    out5 = jax.block_until_ready(activation_forward(x5, params1, alpha1))
    ref5 = reference_forward(x5, params1, alpha1)
    assert out5.dtype == jnp.bfloat16
    assert jnp.allclose(out5.astype(jnp.float32), ref5, atol=2e-2, rtol=2e-2), \
        "mismatch vs reference (test 5)"

    print("KERNEL_OK")
</pallas_src>

<mosaic_0001>
module attributes {stable_mosaic.version = 11 : i64} {
  func.func @kernel(%arg0: i32, %arg1: memref<6xf32, #tpu.memory_space<smem>>, %arg2: memref<1x2048xf32, #tpu.memory_space<vmem>>, %arg3: memref<1x2048xf32, #tpu.memory_space<vmem>>) attributes {dimension_semantics = [#tpu.dimension_semantics<parallel>], iteration_bounds = array<i64: 1>, scalar_prefetch = 1 : i64, scratch_operands = 0 : i64, tpu.core_type = #tpu.core_type<tc>, window_params = [{transform_indices = @transform_0, window_bounds = array<i64: 1, 2048>}, {transform_indices = @transform_1, window_bounds = array<i64: 1, 2048>}]} {
    %c0 = arith.constant 0 : index
    %0 = memref.load %arg1[%c0] : memref<6xf32, #tpu.memory_space<smem>>
    %c1 = arith.constant 1 : index
    %1 = memref.load %arg1[%c1] : memref<6xf32, #tpu.memory_space<smem>>
    %c2 = arith.constant 2 : index
    %2 = memref.load %arg1[%c2] : memref<6xf32, #tpu.memory_space<smem>>
    %c3 = arith.constant 3 : index
    %3 = memref.load %arg1[%c3] : memref<6xf32, #tpu.memory_space<smem>>
    %c4 = arith.constant 4 : index
    %4 = memref.load %arg1[%c4] : memref<6xf32, #tpu.memory_space<smem>>
    %c5 = arith.constant 5 : index
    %5 = memref.load %arg1[%c5] : memref<6xf32, #tpu.memory_space<smem>>
    %c0_0 = arith.constant 0 : index
    %c0_1 = arith.constant 0 : index
    %6 = vector.load %arg2[%c0_0, %c0_1] : memref<1x2048xf32, #tpu.memory_space<vmem>>, vector<1x2048xf32>
    %7 = math.absf %6 : vector<1x2048xf32>
    %8 = vector.broadcast %2 : f32 to vector<1x2048xf32>
    %9 = arith.addf %7, %8 : vector<1x2048xf32>
    %10 = math.sqrt %9 : vector<1x2048xf32>
    %11 = vector.broadcast %3 : f32 to vector<1x2048xf32>
    %12 = arith.addf %10, %11 : vector<1x2048xf32>
    %13 = vector.broadcast %4 : f32 to vector<1x2048xf32>
    %14 = arith.addf %7, %13 : vector<1x2048xf32>
    %15 = math.log %14 : vector<1x2048xf32>
    %16 = vector.broadcast %5 : f32 to vector<1x2048xf32>
    %17 = arith.addf %15, %16 : vector<1x2048xf32>
    %18 = vector.broadcast %1 : f32 to vector<1x2048xf32>
    %19 = arith.mulf %18, %6 : vector<1x2048xf32>
    %20 = math.tanh %19 : vector<1x2048xf32>
    %21 = vector.broadcast %0 : f32 to vector<1x2048xf32>
    %22 = arith.mulf %21, %20 : vector<1x2048xf32>
    %23 = arith.mulf %22, %12 : vector<1x2048xf32>
    %24 = arith.mulf %23, %17 : vector<1x2048xf32>
    %c0_2 = arith.constant 0 : index
    %c0_3 = arith.constant 0 : index
    %25 = vector.load %arg3[%c0_2, %c0_3] : memref<1x2048xf32, #tpu.memory_space<vmem>>, vector<1x2048xf32>
    tpu.vector_store %arg3[%c0_2, %c0_3], %24 {strides = array<i32>} : memref<1x2048xf32, #tpu.memory_space<vmem>>, vector<1x2048xf32>,
    return
  }
  func.func @transform_0(%arg0: i32, %arg1: memref<6xf32, #tpu.memory_space<smem>>) -> (i32, i32) {
    %c0_i32 = arith.constant 0 : i32
    %c0_i32_0 = arith.constant 0 : i32
    return %arg0, %c0_i32 : i32, i32
  }
  func.func @transform_1(%arg0: i32, %arg1: memref<6xf32, #tpu.memory_space<smem>>) -> (i32, i32) {
    %c0_i32 = arith.constant 0 : i32
    %c0_i32_0 = arith.constant 0 : i32
    return %arg0, %c0_i32 : i32, i32
  }
}

</mosaic_0001>

<bundles_post_ra>
// kernel: tpu_custom_call.1
= control target key start
LH: loop header
LB: loop body
LE: loop exit
PB: predicated region body
PF: predicated region fallthrough
CT: control target
= control target key end

     0   :  { %s232_s0 = inlined_call_operand.hbm [shape: f32[6], index: 0, kind: input, shape index: {}]   ;;  %s233_s1 = inlined_call_operand.hbm [shape: f32[1,2048], index: 1, kind: input, shape index: {}]   ;;  %s234_s2 = inlined_call_operand.hbm [shape: f32[1,2048], index: 2, kind: output, shape index: {}]  }
   0x1   :  { %s115_s11 = scalar_lea.hbm %s232_s0, 16 }
   0x2   :  { %p116_p0 = scmp.ne.s32.totalorder %s232_s0, %s115_s11  ;;  %p119_p1 = scmp.lt.u32.totalorder %s115_s11, %s232_s0 }
   0x4   :  { %p121_p2 = pnand %p119_p1, %p116_p0 }
   0x6   :  { %124 = shalt.err (!%p121_p2)  }
   0x7   :  { %s175_s16 = smov [#allocation3]  }
   0x8   :  { %8 = dma.hbm_to_smem %s232_s0, 16, %s175_s16, [#allocation2] }
   0x9   :  { %169 = dma.done.wait [#allocation2], 16 }
   0xa   :  { %170 = vsyncadd [#allocation2], 4294967280 }
   0xb   :  { %10 = sfence }
   0xc   :  { %11 = vsyncpa [#allocation5], 0 }
   0xd   :  { %12 = vsyncpa [#allocation6], 0  ;;  %s176_s19 = smov [#allocation4]   ;;  %s125_s23 = scalar_lea.hbm %s233_s1, 256 }
   0xe   :  { %s19_s20 = sshll.u32 %s176_s19, 4  ;;  %p126_p3 = scmp.ne.s32.totalorder %s233_s1, %s125_s23  ;;  %s20_s20 = int_to_ptr.vmem [resolvable:$true] %s19_s20 }
   0xf   :  { %p129_p4 = scmp.lt.u32.totalorder %s125_s23, %s233_s1 }
  0x11   :  { %p131_p5 = pnand %p129_p4, %p126_p3 }
  0x13   :  { %134 = shalt.err (!%p131_p5)
}
  0x14   :  { %s135_s0 = scalar_lea.vmem %s20_s20, 256  ;;  %p140_p7 = scmp.lt.s32.totalorder %s20_s20, %s20_s20 }
  0x15   :  { %p136_p6 = scmp.ne.s32.totalorder %s20_s20, %s135_s0  ;;  %p141_p8 = scmp.lt.s32.totalorder %s135_s0, %s135_s0 }
  0x17   :  { %p142_p9 = por %p141_p8, %p140_p7 }
  0x19   :  { %p143_p10 = pnand %p142_p9, %p136_p6 }
  0x1b   :  { %146 = shalt.err (!%p143_p10)
}
  0x1c   :  { %22 = dma.hbm_to_vmem [thread:$0]  %s233_s1, 256, %s20_s20, [#allocation5]  }
  0x1d   :  { %171 = dma.done.wait [#allocation5], 256  }
  0x1e   :  { %172 = vsyncadd [#allocation5], 4294967040  ;;  %s95_s30 = sld [smem:[#allocation3 + $0x1]]  ;;  %s96_s3 = sld [smem:[#allocation3 + $0x2]]  ;;  %v32_v0 = vld [vmem:[#allocation4] sm:$0xff]  ;;  %v33_v2 = vld [vmem:[#allocation4 + $0x8] sm:$0xff] }
  0x1f   :  { %s98_s4 = sld [smem:[#allocation3 + $0x4]]  ;;  %v34_v3 = vand.u32 2147483647, %v32_v0  ;;  %v35_v7 = vand.u32 2147483647, %v33_v2  ;;  %s26_s1 = sld [smem:[#allocation3]] }
  0x20   :  { %s217_s5 = sld [smem:[#allocation3 + $0x3]]  ;;  %s99_s6 = sld [smem:[#allocation3 + $0x5]] }
  0x21   :  { %s177_s7 = smov [#allocation7]  }
  0x22   :  { %s86_s8 = sshll.u32 %s177_s7, 4  ;;  %s87_s8 = int_to_ptr.vmem [resolvable:$true] %s86_s8 }
  0x23   :  { %s147_s9 = scalar_lea.vmem %s87_s8, 256  ;;  %p152_p12 = scmp.lt.s32.totalorder %s87_s8, %s87_s8 }
  0x24   :  { %v66_v1 = vstv %s95_s30  ;;  %v36_v4 = vstv %s96_s3  ;;  %p148_p11 = scmp.ne.s32.totalorder %s87_s8, %s147_s9  ;;  %p153_p13 = scmp.lt.s32.totalorder %s147_s9, %s147_s9 }
  0x25   :  { %v67_v5 = vmul.f32 %v66_v1, %v32_v0  ;;  %v56_v6 = vstv %s98_s4  ;;  %v68_v8 = vmul.f32 %v66_v1, %v33_v2  ;;  %v37_v9 = vadd.f32 %v36_v4, %v34_v3 }
  0x26   :  { %v57_v10 = vadd.f32 %v56_v6, %v34_v3  ;;  %v38_v11 = vadd.f32 %v36_v4, %v35_v7  ;;  %v58_v12 = vadd.f32 %v56_v6, %v35_v7  ;;  %v71_v17 = vstv %s26_s1  ;;  %p154_p0 = por %p153_p13, %p152_p12 }
  0x27   :  { %103 = vtanh.f32 %v67_v5  ;;  %vm41_vm0 = vcmp.eq.f32.partialorder %v37_v9, inf  ;;  %v44_v16 = vand.u32 2147483648, %v37_v9  ;;  %vm43_vm1 = vcmp.eq.f32.partialorder %v37_v9, 0.0 }
  0x28   :  { %105 = vtanh.f32 %v68_v8  ;;  %v53_v20 = vstv %s217_s5  ;;  %v63_v23 = vstv %s99_s6  ;;  %vm48_vm2 = vcmp.eq.f32.partialorder %v38_v11, inf  ;;  %p155_p1 = pnand %p154_p0, %p148_p11 }
  0x29   :  { %107 = vrsqrt.f32 %v37_v9  ;;  %v51_v24 = vand.u32 2147483648, %v38_v11  ;;  %vm50_vm3 = vcmp.eq.f32.partialorder %v38_v11, 0.0 }
  0x2a   :  { %109 = vlog2.f32 %v57_v10 }
  0x2b   :  { %111 = vrsqrt.f32 %v38_v11 }
  0x2c   :  { %113 = vlog2.f32 %v58_v12 }
  0x31   :  { %v104_v13 = vpop.eup %103 }
  0x32   :  { %v106_v14 = vpop.eup %105  ;;  %v72_v27 = vmul.f32 %v104_v13, %v71_v17 }
  0x33   :  { %v108_v15 = vpop.eup %107  ;;  %v73_v34 = vmul.f32 %v106_v14, %v71_v17 }
  0x34   :  { %v110_v18 = vpop.eup %109  ;;  %v40_v19 = vmul.f32 %v108_v15, %v37_v9 }
  0x35   :  { %v112_v21 = vpop.eup %111  ;;  %v60_v22 = vmul.f32 0.6931472, %v110_v18 }
  0x36   :  { %v114_v25 = vpop.eup %113  ;;  %v42_v26 = vsel %vm41_vm0, %v37_v9, %v40_v19  ;;  %v47_v28 = vmul.f32 %v112_v21, %v38_v11 }
  0x37   :  { %v45_v29 = vsel %vm43_vm1, %v44_v16, %v42_v26  ;;  %v62_v30 = vmul.f32 0.6931472, %v114_v25  ;;  %v64_v32 = vadd.f32 %v63_v23, %v60_v22 }
  0x38   :  { %v54_v31 = vadd.f32 %v53_v20, %v45_v29  ;;  %v49_v33 = vsel %vm48_vm2, %v38_v11, %v47_v28 }
  0x39   :  { %v52_v35 = vsel %vm50_vm3, %v51_v24, %v49_v33  ;;  %v65_v38 = vadd.f32 %v63_v23, %v62_v30 }
  0x3a   :  { %v74_v36 = vmul.f32 %v72_v27, %v54_v31  ;;  %v55_v37 = vadd.f32 %v53_v20, %v52_v35 }
  0x3c   :  { %v76_v39 = vmul.f32 %v74_v36, %v64_v32  ;;  %v75_v40 = vmul.f32 %v73_v34, %v55_v37 }
  0x3e   :  { %78 = vst [vmem:[#allocation7] sm:$0xff] %v76_v39  ;;  %v77_v41 = vmul.f32 %v75_v40, %v65_v38 }
  0x40   :  { %79 = vst [vmem:[#allocation7 + $0x8] sm:$0xff] %v77_v41 }
  0x41   :  { %158 = shalt.err (!%p155_p1)
}
  0x42   :  { %s159_s12 = scalar_lea.hbm %s234_s2, 256 }
  0x43   :  { %p160_p2 = scmp.ne.s32.totalorder %s234_s2, %s159_s12  ;;  %p163_p3 = scmp.lt.u32.totalorder %s159_s12, %s234_s2 }
  0x45   :  { %p165_p4 = pnand %p163_p3, %p160_p2 }
  0x47   :  { %168 = shalt.err (!%p165_p4)
}
  0x48   :  { %89 = dma.vmem_to_hbm [thread:$0]  %s87_s8, 256, %s234_s2, [#allocation6]  }
  0x49   :  { %173 = dma.done.wait [#allocation6], 256  }
  0x4a   :  { %174 = vsyncadd [#allocation6], 4294967040 }
  0x4b   :  { %93 = vsyncpa [#allocation5], 1 }
  0x4c   :  { %94 = vsyncpa [#allocation6], 1 }

</bundles_post_ra>
